<compile_context>
chip_gen: v5e
topology: v5e:2x2
jax: 0.10.0
libtpu: 0.0.40
codegen_flags: <defaults>
</compile_context>

<pallas_src>
import functools
import math

import jax
import jax.numpy as jnp
from jax.experimental import pallas as pl
from jax.experimental.pallas import tpu as pltpu


# ----------------------------- fused Pallas kernel -----------------------------

def _ffn_kernel(x_ref, w1_ref, b1_ref, w2_ref, b2_ref, w3_ref, b3_ref,
                ln_a_ref, ln_b_ref, o_ref, *, residual, norm, eps, mxu_dtype):
    """One row-tile of the whole FeedForward_deep forward pass.

    x_ref:  (tm, H)      row tile of the flattened input
    w*_ref: full (in,out) weight blocks, resident across grid steps
    b*_ref: (1, out) bias rows
    """
    x = x_ref[...]
    x_f32 = x.astype(jnp.float32)

    def mm(a, w_ref):
        w = w_ref[...]
        if mxu_dtype is not None:              # optional bf16 feed to the MXU (v6e/v7x)
            a = a.astype(mxu_dtype)
            w = w.astype(mxu_dtype)
        return jnp.dot(a, w, preferred_element_type=jnp.float32)

    # fc: Linear(H, MID) + ReLU               (dropout = identity at eval)
    h = jnp.maximum(mm(x_f32, w1_ref) + b1_ref[...], 0.0)
    # mlp.fc: Linear(MID, MID) + ReLU         (dropout = identity at eval)
    h = jnp.maximum(mm(h, w2_ref) + b2_ref[...], 0.0)
    # mlp.linear: Linear(MID, H)              (+ outer dropout = identity at eval)
    out = mm(h, w3_ref) + b3_ref[...]

    if residual:
        out = x_f32 + out
    if norm:
        hsz = out.shape[-1]
        mean = jnp.mean(out, axis=-1, keepdims=True)
        # torch .std(): unbiased (N-1) and eps added to std (not var), per the reference
        var = jnp.sum((out - mean) ** 2, axis=-1, keepdims=True) / (hsz - 1)
        inv = 1.0 / (jnp.sqrt(var) + eps)      # reciprocal on the (tm,1) column only
        out = ln_a_ref[...] * (out - mean) * inv + ln_b_ref[...]

    o_ref[...] = out.astype(o_ref.dtype)


# ----------------------------- wrapper -----------------------------

def _pick_row_tile(M, target=256):
    """Largest multiple-of-8 divisor of M <= target, preferring >=2 grid steps
    (so the 'parallel' axis can be sharded across v7x's two TensorCores)."""
    cands = [t for t in range(8, min(M, target) + 1, 8) if M % t == 0]
    if not cands:
        return M                               # full-extent block is always legal
    multi = [t for t in cands if M // t >= 2]
    return max(multi) if multi else max(cands)


def feedforward_deep(params, x, *, residual=False, norm=False, eps=1e-6,
                     mxu_dtype=None):
    """x: (B, L, HSIZE) -> (B, L, HSIZE) via a single fused pallas_call."""
    B, L, H = x.shape
    M = B * L
    x2d = x.reshape(M, H)

    w1, b1 = params["w1"], params["b1"]        # (H, MID), (1, MID)
    w2, b2 = params["w2"], params["b2"]        # (MID, MID), (1, MID)
    w3, b3 = params["w3"], params["b3"]        # (MID, H), (1, H)
    ln_a, ln_b = params["ln_a"], params["ln_b"]  # (1, H)
    MID = w1.shape[1]

    tm = _pick_row_tile(M)
    grid = (M // tm,)

    kernel = functools.partial(_ffn_kernel, residual=residual, norm=norm,
                               eps=eps, mxu_dtype=mxu_dtype)

    out2d = pl.pallas_call(
        kernel,
        out_shape=jax.ShapeDtypeStruct((M, H), x.dtype),
        grid=grid,
        in_specs=[
            pl.BlockSpec((tm, H), lambda i: (i, 0)),       # x row tile
            pl.BlockSpec((H, MID), lambda i: (0, 0)),      # w1 (resident)
            pl.BlockSpec((1, MID), lambda i: (0, 0)),      # b1
            pl.BlockSpec((MID, MID), lambda i: (0, 0)),    # w2
            pl.BlockSpec((1, MID), lambda i: (0, 0)),      # b2
            pl.BlockSpec((MID, H), lambda i: (0, 0)),      # w3
            pl.BlockSpec((1, H), lambda i: (0, 0)),        # b3
            pl.BlockSpec((1, H), lambda i: (0, 0)),        # ln_a
            pl.BlockSpec((1, H), lambda i: (0, 0)),        # ln_b
        ],
        out_specs=pl.BlockSpec((tm, H), lambda i: (i, 0)),
        compiler_params=pltpu.CompilerParams(
            dimension_semantics=("parallel",),
        ),
    )(x2d, w1, b1, w2, b2, w3, b3, ln_a, ln_b)

    return out2d.reshape(B, L, H)


def prepare_params(pt_params):
    """One-time layout prep (outside the per-call path): PyTorch Linear weights are
    stored (out, in); keep them as (in, out) so no transpose copy happens per forward."""
    return {
        "w1": pt_params["fc.linear.weight"].T,
        "b1": pt_params["fc.linear.bias"].reshape(1, -1),
        "w2": pt_params["mlp.fc.linear.weight"].T,
        "b2": pt_params["mlp.fc.linear.bias"].reshape(1, -1),
        "w3": pt_params["mlp.linear.weight"].T,
        "b3": pt_params["mlp.linear.bias"].reshape(1, -1),
        "ln_a": pt_params["ln.a_2"].reshape(1, -1),
        "ln_b": pt_params["ln.b_2"].reshape(1, -1),
    }


# ----------------------------- demo -----------------------------

if __name__ == "__main__":
    HSIZE = 128
    MID = 2 * HSIZE                            # mid_k=None -> MID_SIZE = 2 * HSIZE
    B, L = 2, 8                                # x: (batch, seq, hidden)

    key = jax.random.PRNGKey(0)
    kx, k1, kb1, k2, kb2, k3, kb3 = jax.random.split(key, 7)
    x = jax.random.normal(kx, (B, L, HSIZE), jnp.float32)

    def init_linear(kw, kb, fan_in, fan_out):  # PyTorch default init, (out, in) layout
        bound = 1.0 / math.sqrt(fan_in)
        w = jax.random.uniform(kw, (fan_out, fan_in), jnp.float32, -bound, bound)
        b = jax.random.uniform(kb, (fan_out,), jnp.float32, -bound, bound)
        return w, b

    w1, b1 = init_linear(k1, kb1, HSIZE, MID)
    w2, b2 = init_linear(k2, kb2, MID, MID)
    w3, b3 = init_linear(k3, kb3, MID, HSIZE)

    pt_params = {
        "fc.linear.weight": w1, "fc.linear.bias": b1,
        "mlp.fc.linear.weight": w2, "mlp.fc.linear.bias": b2,
        "mlp.linear.weight": w3, "mlp.linear.bias": b3,
        "ln.a_2": jnp.ones((HSIZE,), jnp.float32),
        "ln.b_2": jnp.zeros((HSIZE,), jnp.float32),
    }
    params = prepare_params(pt_params)         # one-time layout cost

    # default module config: norm=False, residual=False
    out = jax.block_until_ready(feedforward_deep(params, x))
    assert out.shape == (B, L, HSIZE)
    assert jnp.all(jnp.isfinite(out))

    # reference check (plain JAX) for the default path
    def ref(x2d):
        h = jnp.maximum(x2d @ params["w1"] + params["b1"], 0.0)
        h = jnp.maximum(h @ params["w2"] + params["b2"], 0.0)
        return h @ params["w3"] + params["b3"]
    r = ref(x.reshape(-1, HSIZE)).reshape(B, L, HSIZE)
    assert jnp.allclose(out, r, atol=1e-4, rtol=1e-4)

    # also exercise the residual + LayerNorm path (fused in the same kernel)
    out2 = jax.block_until_ready(feedforward_deep(params, x, residual=True, norm=True))
    assert out2.shape == (B, L, HSIZE)
    assert jnp.all(jnp.isfinite(out2))

    # TODO(synk): training-mode stochastic dropout not implemented (eval identity only).
    print("KERNEL_OK")
</pallas_src>

<mosaic_0001>
module attributes {stable_mosaic.version = 11 : i64} {
  func.func @_ffn_kernel(%arg0: i32, %arg1: memref<8x128xf32, #tpu.memory_space<vmem>>, %arg2: memref<128x256xf32, #tpu.memory_space<vmem>>, %arg3: memref<1x256xf32, #tpu.memory_space<vmem>>, %arg4: memref<256x256xf32, #tpu.memory_space<vmem>>, %arg5: memref<1x256xf32, #tpu.memory_space<vmem>>, %arg6: memref<256x128xf32, #tpu.memory_space<vmem>>, %arg7: memref<1x128xf32, #tpu.memory_space<vmem>>, %arg8: memref<1x128xf32, #tpu.memory_space<vmem>>, %arg9: memref<1x128xf32, #tpu.memory_space<vmem>>, %arg10: memref<8x128xf32, #tpu.memory_space<vmem>>) attributes {dimension_semantics = [#tpu.dimension_semantics<parallel>], iteration_bounds = array<i64: 2>, scalar_prefetch = 0 : i64, scratch_operands = 0 : i64, tpu.core_type = #tpu.core_type<tc>, window_params = [{transform_indices = @transform_0, window_bounds = array<i64: 8, 128>}, {pipeline_mode = #tpu.pipeline_mode<synchronous>, transform_indices = @transform_1, window_bounds = array<i64: 128, 256>}, {pipeline_mode = #tpu.pipeline_mode<synchronous>, transform_indices = @transform_2, window_bounds = array<i64: 1, 256>}, {pipeline_mode = #tpu.pipeline_mode<synchronous>, transform_indices = @transform_3, window_bounds = array<i64: 256, 256>}, {pipeline_mode = #tpu.pipeline_mode<synchronous>, transform_indices = @transform_4, window_bounds = array<i64: 1, 256>}, {pipeline_mode = #tpu.pipeline_mode<synchronous>, transform_indices = @transform_5, window_bounds = array<i64: 256, 128>}, {pipeline_mode = #tpu.pipeline_mode<synchronous>, transform_indices = @transform_6, window_bounds = array<i64: 1, 128>}, {pipeline_mode = #tpu.pipeline_mode<synchronous>, transform_indices = @transform_7, window_bounds = array<i64: 1, 128>}, {pipeline_mode = #tpu.pipeline_mode<synchronous>, transform_indices = @transform_8, window_bounds = array<i64: 1, 128>}, {transform_indices = @transform_9, window_bounds = array<i64: 8, 128>}]} {
    %c0 = arith.constant 0 : index
    %c0_0 = arith.constant 0 : index
    %0 = vector.load %arg1[%c0, %c0_0] : memref<8x128xf32, #tpu.memory_space<vmem>>, vector<8x128xf32>
    %c0_1 = arith.constant 0 : index
    %c0_2 = arith.constant 0 : index
    %1 = vector.load %arg2[%c0_1, %c0_2] : memref<128x256xf32, #tpu.memory_space<vmem>>, vector<128x256xf32>
    %cst = arith.constant dense<0.000000e+00> : vector<8x256xf32>
    %2 = tpu.matmul %0, %1, %cst {dimension_numbers = #tpu.dot_dimension_numbers<[1], [0], [0], [1], [0, 0, 1, 1], [], []>} : vector<8x128xf32>, vector<128x256xf32>, vector<8x256xf32> -> vector<8x256xf32>
    %c0_3 = arith.constant 0 : index
    %c0_4 = arith.constant 0 : index
    %3 = vector.load %arg3[%c0_3, %c0_4] : memref<1x256xf32, #tpu.memory_space<vmem>>, vector<1x256xf32>
    %4 = vector.broadcast %3 : vector<1x256xf32> to vector<8x256xf32>
    %5 = arith.addf %2, %4 : vector<8x256xf32>
    %cst_5 = arith.constant 0.000000e+00 : f32
    %6 = vector.broadcast %cst_5 : f32 to vector<8x256xf32>
    %7 = arith.maximumf %5, %6 : vector<8x256xf32>
    %c0_6 = arith.constant 0 : index
    %c0_7 = arith.constant 0 : index
    %8 = vector.load %arg4[%c0_6, %c0_7] : memref<256x256xf32, #tpu.memory_space<vmem>>, vector<256x256xf32>
    %cst_8 = arith.constant dense<0.000000e+00> : vector<8x256xf32>
    %9 = tpu.matmul %7, %8, %cst_8 {dimension_numbers = #tpu.dot_dimension_numbers<[1], [0], [0], [1], [0, 0, 1, 1], [], []>} : vector<8x256xf32>, vector<256x256xf32>, vector<8x256xf32> -> vector<8x256xf32>
    %c0_9 = arith.constant 0 : index
    %c0_10 = arith.constant 0 : index
    %10 = vector.load %arg5[%c0_9, %c0_10] : memref<1x256xf32, #tpu.memory_space<vmem>>, vector<1x256xf32>
    %11 = vector.broadcast %10 : vector<1x256xf32> to vector<8x256xf32>
    %12 = arith.addf %9, %11 : vector<8x256xf32>
    %cst_11 = arith.constant 0.000000e+00 : f32
    %13 = vector.broadcast %cst_11 : f32 to vector<8x256xf32>
    %14 = arith.maximumf %12, %13 : vector<8x256xf32>
    %c0_12 = arith.constant 0 : index
    %c0_13 = arith.constant 0 : index
    %15 = vector.load %arg6[%c0_12, %c0_13] : memref<256x128xf32, #tpu.memory_space<vmem>>, vector<256x128xf32>
    %cst_14 = arith.constant dense<0.000000e+00> : vector<8x128xf32>
    %16 = tpu.matmul %14, %15, %cst_14 {dimension_numbers = #tpu.dot_dimension_numbers<[1], [0], [0], [1], [0, 0, 1, 1], [], []>} : vector<8x256xf32>, vector<256x128xf32>, vector<8x128xf32> -> vector<8x128xf32>
    %c0_15 = arith.constant 0 : index
    %c0_16 = arith.constant 0 : index
    %17 = vector.load %arg7[%c0_15, %c0_16] : memref<1x128xf32, #tpu.memory_space<vmem>>, vector<1x128xf32>
    %18 = vector.broadcast %17 : vector<1x128xf32> to vector<8x128xf32>
    %19 = arith.addf %16, %18 : vector<8x128xf32>
    %c0_17 = arith.constant 0 : index
    %c0_18 = arith.constant 0 : index
    %20 = vector.load %arg10[%c0_17, %c0_18] : memref<8x128xf32, #tpu.memory_space<vmem>>, vector<8x128xf32>
    tpu.vector_store %arg10[%c0_17, %c0_18], %19 {strides = array<i32>} : memref<8x128xf32, #tpu.memory_space<vmem>>, vector<8x128xf32>,
    return
  }
  func.func @transform_0(%arg0: i32) -> (i32, i32) {
    %c0_i32 = arith.constant 0 : i32
    %c0_i32_0 = arith.constant 0 : i32
    return %arg0, %c0_i32 : i32, i32
  }
  func.func @transform_1(%arg0: i32) -> (i32, i32) {
    %c0_i32 = arith.constant 0 : i32
    %c0_i32_0 = arith.constant 0 : i32
    %c0_i32_1 = arith.constant 0 : i32
    return %c0_i32, %c0_i32_0 : i32, i32
  }
  func.func @transform_2(%arg0: i32) -> (i32, i32) {
    %c0_i32 = arith.constant 0 : i32
    %c0_i32_0 = arith.constant 0 : i32
    %c0_i32_1 = arith.constant 0 : i32
    return %c0_i32, %c0_i32_0 : i32, i32
  }
  func.func @transform_3(%arg0: i32) -> (i32, i32) {
    %c0_i32 = arith.constant 0 : i32
    %c0_i32_0 = arith.constant 0 : i32
    %c0_i32_1 = arith.constant 0 : i32
    return %c0_i32, %c0_i32_0 : i32, i32
  }
  func.func @transform_4(%arg0: i32) -> (i32, i32) {
    %c0_i32 = arith.constant 0 : i32
    %c0_i32_0 = arith.constant 0 : i32
    %c0_i32_1 = arith.constant 0 : i32
    return %c0_i32, %c0_i32_0 : i32, i32
  }
  func.func @transform_5(%arg0: i32) -> (i32, i32) {
    %c0_i32 = arith.constant 0 : i32
    %c0_i32_0 = arith.constant 0 : i32
    %c0_i32_1 = arith.constant 0 : i32
    return %c0_i32, %c0_i32_0 : i32, i32
  }
  func.func @transform_6(%arg0: i32) -> (i32, i32) {
    %c0_i32 = arith.constant 0 : i32
    %c0_i32_0 = arith.constant 0 : i32
    %c0_i32_1 = arith.constant 0 : i32
    return %c0_i32, %c0_i32_0 : i32, i32
  }
  func.func @transform_7(%arg0: i32) -> (i32, i32) {
    %c0_i32 = arith.constant 0 : i32
    %c0_i32_0 = arith.constant 0 : i32
    %c0_i32_1 = arith.constant 0 : i32
    return %c0_i32, %c0_i32_0 : i32, i32
  }
  func.func @transform_8(%arg0: i32) -> (i32, i32) {
    %c0_i32 = arith.constant 0 : i32
    %c0_i32_0 = arith.constant 0 : i32
    %c0_i32_1 = arith.constant 0 : i32
    return %c0_i32, %c0_i32_0 : i32, i32
  }
  func.func @transform_9(%arg0: i32) -> (i32, i32) {
    %c0_i32 = arith.constant 0 : i32
    %c0_i32_0 = arith.constant 0 : i32
    return %arg0, %c0_i32 : i32, i32
  }
}

</mosaic_0001>

<bundles_post_ra>
// kernel: tpu_custom_call.1
= control target key start
LH: loop header
LB: loop body
LE: loop exit
PB: predicated region body
PF: predicated region fallthrough
CT: control target
= control target key end

     0   :  { %s1424_s0 = inlined_call_operand.hbm [shape: f32[16,128], index: 0, kind: input, shape index: {}]   ;;  %s1425_s1 = inlined_call_operand.hbm [shape: f32[128,256], index: 1, kind: input, shape index: {}]   ;;  %s1426_s2 = inlined_call_operand.hbm [shape: f32[1,256], index: 2, kind: input, shape index: {}]   ;;  %s1427_s3 = inlined_call_operand.hbm [shape: f32[256,256], index: 3, kind: input, shape index: {}]   ;;  %s1428_s4 = inlined_call_operand.vmem [shape: f32[1,256], index: 4, kind: input, shape index: {}]   ;;  %s1429_s5 = inlined_call_operand.hbm [shape: f32[256,128], index: 5, kind: input, shape index: {}]   ;;  %s1430_s6 = inlined_call_operand.vmem [shape: f32[1,128], index: 6, kind: input, shape index: {}]   ;;  %s1431_s7 = inlined_call_operand.vmem [shape: f32[1,128], index: 7, kind: input, shape index: {}]   ;;  %s1432_s8 = inlined_call_operand.vmem [shape: f32[1,128], index: 8, kind: input, shape index: {}]   ;;  %s1433_s9 = inlined_call_operand.hbm [shape: f32[16,128], index: 9, kind: output, shape index: {}]  }
   0x1   :  { %1434 = sst [smem:[#allocation16_spill]] %s1425_s1 }
   0x2   :  { %1435 = sst [smem:[#allocation17_spill]] %s1426_s2 }
   0x3   :  { %14 = vsyncpa [#allocation3], 0 }
   0x4   :  { %16 = vsyncpa [#allocation3 + $0x1], 0 }
   0x5   :  { %17 = vsyncpa [#allocation6], 0 }
   0x6   :  { %18 = vsyncpa [#allocation9], 0 }
   0x7   :  { %19 = vsyncpa [#allocation4], 0 }
   0x8   :  { %21 = vsyncpa [#allocation4 + $0x1], 0  ;;  %s1244_s30 = smov 0   ;;  %s1246_s10 = smov 0  }
   0x9   :  { %s1248_s11 = smov 0   ;;  %s1250_s12 = smov 0  }
   0xa LB: > { %s1436_s1 = sld [smem:[#allocation16_spill]]  ;;  %s1268_s14 = sadd.s32 4294967295, %s1184_s12   ;;  %s1184_s12 = sphi %s1250_s12, %s1449_s12   ;;  %s1180_s11 = sphi %s1248_s11, %s1448_s11   ;;  %s1176_s10 = sphi %s1246_s10, %s1447_s10   ;;  %s1172_s30 = sphi %s1244_s30, %s1446_s30  }
   0xb   : > { %p849_p0 = scmp.ge.s32.totalorder %s1184_s12, 1  ;;  %p48_p1 = scmp.eq.s32.totalorder %s1268_s14, 0 }
   0xc   : > { %p252_p2 = scmp.lt.s32.totalorder %s1184_s12, 3  ;;  %s1186_s16 = smov [#allocation5]  }
   0xd   : > { %s265_s17 = sshll.u32 %s1186_s16, 4  ;;  %s289_s20 = sshll.u32 %s1427_s3, 4  ;;  %s266_s17 = int_to_ptr.vmem [resolvable:$true] %s265_s17  ;;  %s290_s20 = int_to_ptr.hbm [resolvable:$true] %s289_s20 }
   0xe   : > { %p1273_p3 = pnand %p849_p0, %p252_p2  ;;  %s1439_s2 = sld [smem:[#allocation17_spill]] }
   0xf   : > { %s1187_s25 = smov [#allocation8]   ;;  %s1188_s27 = smov 256  }
  0x10   : > { %s263_s13 = sshll.u32 %s1436_s1, 4  ;;  %p888_p4 = pneg %p1273_p3  ;;  %s264_s13 = int_to_ptr.hbm [resolvable:$true] %s263_s13 }
  0x11   : > { %s291_s26 = sshll.u32 %s1187_s25, 4  ;;  %s1189_s28 = smov 16   ;;  %s292_s26 = int_to_ptr.vmem [resolvable:$true] %s291_s26 }
  0x12   : > { %p1285_p6 = pnand %p888_p4, %p48_p1  ;;  %s306_s8 = sshll.u32 %s1429_s5, 4  ;;  %s307_s8 = int_to_ptr.hbm [resolvable:$true] %s306_s8 }
  0x13   : > { %s1190_s16 = smov [#allocation7]   ;;  %s1192_s19 = smov 128  }
  0x14   : > { %s278_s24 = sshll.u32 %s1439_s2, 4  ;;  %s280_s18 = sshll.u32 %s1190_s16, 4  ;;  %s279_s24 = int_to_ptr.hbm [resolvable:$true] %s278_s24  ;;  %s281_s18 = int_to_ptr.vmem [resolvable:$true] %s280_s18 }
  0x15   : > { %891 = dma.hbm_to_vmem [thread:$0]  (!%p1285_p6), %s264_s13, 4096, %s266_s17, [#allocation6], %s1188_s27, %s1188_s27, %s1189_s28  }
  0x16   : > { %897 = dma.hbm_to_vmem [thread:$0]  (!%p1285_p6), %s290_s20, 8192, %s292_s26, [#allocation9], %s1188_s27, %s1188_s27, %s1189_s28  }
  0x17   : > { %894 = dma.hbm_to_vmem [thread:$0]  (!%p1285_p6), %s279_s24, 32, %s281_s18, [#allocation6]  }
  0x18   : > { %s1191_s13 = smov [#allocation10]   ;;  %s1193_s20 = smov 8  }
  0x19   : > { %s308_s17 = sshll.u32 %s1191_s13, 4  ;;  %s848_s22 = sadd.s32 4294967294, %s1184_s12   ;;  %s309_s17 = int_to_ptr.vmem [resolvable:$true] %s308_s17 }
  0x1a   : > { %900 = dma.hbm_to_vmem [thread:$0]  (!%p1285_p6), %s307_s8, 4096, %s309_s17, [#allocation9], %s1192_s19, %s1192_s19, %s1193_s20  }
  0x1b   : > { %s1305_s23 = sadd.s32 1, %s1184_s12   ;;  %s34_s26 = sadd.s32 1, %s1180_s11 }
  0x1c   : > { %s31_s25 = ssub.s32 %s1184_s12, %s1305_s23  ;;  %p41_p8 = scmp.ne.s32.totalorder %s1180_s11, %s1176_s10 }
  0x1d   : > { %p32_p7 = scmp.eq.s32.totalorder %s31_s25, 0  ;;  %p42_p9 = scmp.eq.s32.totalorder %s1184_s12, 0 }
  0x1e   : > { %p47_p10 = scmp.ne.s32.totalorder %s1176_s10, %s1172_s30  ;;  %p239_p13 = scmp.eq.s32.totalorder %s1268_s14, 1 }
  0x1f   : > { %s1316_s24 = scalar_select %p32_p7, %s1180_s11, %s34_s26  }
  0x20   : > { %p1318_p11 = por %p42_p9, %p41_p8  ;;  %p1324_p12 = por %p48_p1, %p47_p10 }
  0x21   : > { %p245_p0 = scmp.eq.s32.totalorder %s848_s22, 1  ;;  %p913_p2 = scmp.lt.s32.totalorder %s1184_s12, 2 }
  0x22   : > { %s331_s28 = sand.u32 1, %s1180_s11   ;;  %p1331_p4 = por %p239_p13, %p41_p8 }
  0x23   : > { %p1335_p6 = por %p245_p0, %p47_p10  ;;  %s855_s8 = sshll.u32 %s331_s28, 3 }
  0x24   : > { %s856_s16 = sshll.u32 %s1184_s12, 3  ;;  %s335_s19 = scalar_lea.vmem [#allocation2], %s855_s8 }
  0x25   : > { %s339_s17 = scalar_lea.hbm %s1424_s0, %s856_s16  ;;  %s343_s20 = sshll.u32 %s335_s19, 4  ;;  %s344_s20 = int_to_ptr.vmem [resolvable:$true] %s343_s20 }
  0x26   : > { %s341_s25 = sshll.u32 %s339_s17, 4  ;;  %p1345_p7 = pnand %p913_p2, %p1318_p11  ;;  %s342_s25 = int_to_ptr.hbm [resolvable:$true] %s341_s25 }
  0x27   : > { %s332_s26 = scalar_lea.sflag [#allocation3], %s331_s28  ;;  %s1080_s1 = sshra.s32 %s342_s25, 4  ;;  %s1081_s1 = int_to_ptr.hbm [resolvable:$true] %s1080_s1 }
  0x28   : > { %s1082_s2 = scalar_lea.hbm %s1081_s1, 8  ;;  %p1084_p9 = pneg %p1345_p7 }
  0x29   : > { %p1083_p8 = scmp.ne.s32.totalorder %s1081_s1, %s1082_s2  ;;  %s1087_s18 = scalar_lea.hbm %s1424_s0, 16 }
  0x2a   : > { %p1088_p11 = scmp.lt.s32.totalorder %s1081_s1, %s1424_s0  ;;  %p1089_p0 = scmp.lt.s32.totalorder %s1087_s18, %s1082_s2 }
  0x2b   : > { %p1085_p10 = pnand %p1084_p9, %p1083_p8 }
  0x2c   : > { %p1090_p2 = por %p1089_p0, %p1088_p11 }
  0x2d   : > { %p1086_p13 = pneg %p1085_p10 }
  0x2f   : > { %p1091_p5 = pnand %p1090_p2, %p1086_p13 }
  0x31   : > { %1094 = shalt.err (!%p1091_p5)
}
  0x32   : > { %904 = dma.hbm_to_vmem [thread:$0]  (!%p1345_p7), %s342_s25, 128, %s344_s20, %s332_s26  }
  0x33   : > { %352 = sbr.rel (%p1273_p3) target bundleno = 500 (0x1f4), region = 56  ;;  %s1362_s28 = sand.u32 (!%p1273_p3), 1, %s1176_s10  }
  0x34   : > { %s858_s17 = sshll.u32 (!%p1273_p3), %s1362_s28, 3  ;;  %s355_s19 = scalar_lea.sflag (!%p1273_p3), [#allocation3], %s1362_s28 }
  0x35   : > { %s1368_s1 = scalar_lea.vmem (!%p1273_p3), [#allocation2], %s858_s17 }
  0x38   : > { %1155 = dma.done.wait (%p1324_p12), %s355_s19, 128  }
  0x39   : > { %1157 = vsyncadd (%p1324_p12), %s355_s19, 4294967168 }
  0x3a   : > { %1159 = dma.done.wait (%p48_p1), [#allocation6], 4128  }
  0x3b   : > { %1161 = vsyncadd (%p48_p1), [#allocation6], 4294963168 }
  0x3c   : > { %1163 = dma.done.wait (%p48_p1), [#allocation9], 12288  }
  0x3d   : > { %1165 = vsyncadd (%p48_p1), [#allocation9], 4294955008  ;;  %v445_v0 = vld [vmem:[#allocation5 + $0xf0] sm:$0xff]  ;;  %v443_v1 = vld [vmem:[#allocation5 + $0xe0] sm:$0xff]  ;;  %s865_s21 = sshll.u32 %s1268_s14, 3  ;;  %s413_s16 = scalar_lea.vmem [#allocation11], %s858_s17 }
  0x3e   : > { %v446_v2 = vld [vmem:[#allocation5 + $0xf8] sm:$0xff]  ;;  %453 = vmatpush.msra.mxu0 %v445_v0  ;;  %v444_v3 = vld [vmem:[#allocation5 + $0xe8] sm:$0xff]  ;;  %v441_v4 = vld [vmem:[#allocation5 + $0xd0] sm:$0xff]  ;;  %s735_s8 = scalar_lea.hbm %s1433_s9, %s865_s21  ;;  %s737_s18 = sshll.u32 %s413_s16, 4  ;;  %s738_s18 = int_to_ptr.vmem [resolvable:$true] %s737_s18 }
  0x3f   : > { %473 = vmatpush.msra.mxu1 %v446_v2  ;;  %v442_v5 = vld [vmem:[#allocation5 + $0xd8] sm:$0xff]  ;;  %v439_v6 = vld [vmem:[#allocation5 + $0xc0] sm:$0xff]  ;;  %v440_v7 = vld [vmem:[#allocation5 + $0xc8] sm:$0xff]  ;;  %s739_s13 = sshll.u32 %s735_s8, 4  ;;  %s725_s14 = scalar_lea.sflag [#allocation4], %s1362_s28  ;;  %s740_s13 = int_to_ptr.hbm [resolvable:$true] %s739_s13 }
  0x40   : > { %454 = vmatpush.msra.mxu0 %v443_v1  ;;  %v437_v8 = vld [vmem:[#allocation5 + $0xb0] sm:$0xff]  ;;  %v438_v9 = vld [vmem:[#allocation5 + $0xb8] sm:$0xff]  ;;  %v435_v10 = vld [vmem:[#allocation5 + $0xa0] sm:$0xff]  ;;  %s1124_s27 = sshra.s32 %s740_s13, 4  ;;  %s1130_s17 = scalar_lea.hbm %s1433_s9, 16  ;;  %s1125_s27 = int_to_ptr.hbm [resolvable:$true] %s1124_s27 }
  0x41   : > { %474 = vmatpush.msra.mxu1 %v444_v3  ;;  %v436_v11 = vld [vmem:[#allocation5 + $0xa8] sm:$0xff]  ;;  %v433_v12 = vld [vmem:[#allocation5 + $0x90] sm:$0xff]  ;;  %v434_v13 = vld [vmem:[#allocation5 + $0x98] sm:$0xff]  ;;  %s1126_s19 = scalar_lea.hbm %s1125_s27, 8  ;;  %p1131_p12 = scmp.lt.s32.totalorder %s1125_s27, %s1433_s9 }
  0x42   : > { %455 = vmatpush.msra.mxu0 %v441_v4  ;;  %v525_v14 = vld [vmem:[#allocation8 + $0xf0] sm:$0xff]  ;;  %v523_v15 = vld [vmem:[#allocation8 + $0xe0] sm:$0xff]  ;;  %v526_v52 = vld [vmem:[#allocation8 + $0xf8] sm:$0xff]  ;;  %p1127_p1 = scmp.ne.s32.totalorder %s1125_s27, %s1126_s19  ;;  %p1132_p7 = scmp.lt.s32.totalorder %s1130_s17, %s1126_s19 }
  0x43   : > { %475 = vmatpush.msra.mxu1 %v442_v5  ;;  %v431_v16 = vld [vmem:[#allocation5 + $0x80] sm:$0xff]  ;;  %v432_v17 = vld [vmem:[#allocation5 + $0x88] sm:$0xff]  ;;  %565 = vmatpush.msra.mxu2 %v525_v14  ;;  %v557_v18 = vld [vmem:[#allocation8 + $0x1f0] sm:$0xff] }
  0x44   : > { %456 = vmatpush.msra.mxu0 %v439_v6  ;;  %v521_v19 = vld [vmem:[#allocation8 + $0xd0] sm:$0xff]  ;;  %v555_v20 = vld [vmem:[#allocation8 + $0x1e0] sm:$0xff]  ;;  %585 = vmatpush.msra.mxu3 %v557_v18  ;;  %v558_v53 = vld [vmem:[#allocation8 + $0x1f8] sm:$0xff]  ;;  %p1128_p3 = pnand %p1127_p1, %p1331_p4  ;;  %p1133_p8 = por %p1132_p7, %p1131_p12 }
  0x45   : > { %476 = vmatpush.msra.mxu1 %v440_v7  ;;  %v429_v21 = vld [vmem:[#allocation5 + $0x70] sm:$0xff]  ;;  %v430_v22 = vld [vmem:[#allocation5 + $0x78] sm:$0xff]  ;;  %566 = vmatpush.msra.mxu2 %v523_v15  ;;  %v519_v23 = vld [vmem:[#allocation8 + $0xc0] sm:$0xff] }
  0x46   : > { %457 = vmatpush.msra.mxu0 %v437_v8  ;;  %v553_v24 = vld [vmem:[#allocation8 + $0x1d0] sm:$0xff]  ;;  %v427_v25 = vld [vmem:[#allocation5 + $0x60] sm:$0xff]  ;;  %v428_v26 = vld [vmem:[#allocation5 + $0x68] sm:$0xff]  ;;  %586 = vmatpush.msra.mxu3 %v555_v20  ;;  %p1129_p5 = pneg %p1128_p3 }
  0x47   : > { %477 = vmatpush.msra.mxu1 %v438_v9  ;;  %567 = vmatpush.msra.mxu2 %v521_v19  ;;  %v517_v27 = vld [vmem:[#allocation8 + $0xb0] sm:$0xff]  ;;  %v551_v28 = vld [vmem:[#allocation8 + $0x1c0] sm:$0xff]  ;;  %v524_v56 = vld [vmem:[#allocation8 + $0xe8] sm:$0xff] }
  0x48   : > { %458 = vmatpush.msra.mxu0 %v435_v10  ;;  %v425_v29 = vld [vmem:[#allocation5 + $0x50] sm:$0xff]  ;;  %v426_v30 = vld [vmem:[#allocation5 + $0x58] sm:$0xff]  ;;  %587 = vmatpush.msra.mxu3 %v553_v24  ;;  %v515_v31 = vld [vmem:[#allocation8 + $0xa0] sm:$0xff]  ;;  %p1134_p9 = pnand %p1133_p8, %p1129_p5 }
  0x49   : > { %478 = vmatpush.msra.mxu1 %v436_v11  ;;  %568 = vmatpush.msra.mxu2 %v519_v23  ;;  %v549_v32 = vld [vmem:[#allocation8 + $0x1b0] sm:$0xff]  ;;  %v423_v33 = vld [vmem:[#allocation5 + $0x40] sm:$0xff]  ;;  %v424_v34 = vld [vmem:[#allocation5 + $0x48] sm:$0xff] }
  0x4a   : > { %459 = vmatpush.msra.mxu0 %v433_v12  ;;  %588 = vmatpush.msra.mxu3 %v551_v28  ;;  %v513_v35 = vld [vmem:[#allocation8 + $0x90] sm:$0xff]  ;;  %v547_v36 = vld [vmem:[#allocation8 + $0x1a0] sm:$0xff]  ;;  %v556_v57 = vld [vmem:[#allocation8 + $0x1e8] sm:$0xff] }
  0x4b   : > { %479 = vmatpush.msra.mxu1 %v434_v13  ;;  %569 = vmatpush.msra.mxu2 %v517_v27  ;;  %v421_v37 = vld [vmem:[#allocation5 + $0x30] sm:$0xff]  ;;  %v422_v38 = vld [vmem:[#allocation5 + $0x38] sm:$0xff]  ;;  %v511_v39 = vld [vmem:[#allocation8 + $0x80] sm:$0xff] }
  0x4c   : > { %460 = vmatpush.msra.mxu0 %v431_v16  ;;  %589 = vmatpush.msra.mxu3 %v549_v32  ;;  %v545_v40 = vld [vmem:[#allocation8 + $0x190] sm:$0xff]  ;;  %v419_v41 = vld [vmem:[#allocation5 + $0x20] sm:$0xff]  ;;  %v420_v42 = vld [vmem:[#allocation5 + $0x28] sm:$0xff] }
  0x4d   : > { %480 = vmatpush.msra.mxu1 %v432_v17  ;;  %570 = vmatpush.msra.mxu2 %v515_v31  ;;  %v509_v43 = vld [vmem:[#allocation8 + $0x70] sm:$0xff]  ;;  %v543_v44 = vld [vmem:[#allocation8 + $0x180] sm:$0xff]  ;;  %v522_v60 = vld [vmem:[#allocation8 + $0xd8] sm:$0xff] }
  0x4e   : > { %461 = vmatpush.msra.mxu0 %v429_v21  ;;  %590 = vmatpush.msra.mxu3 %v547_v36  ;;  %v417_v45 = vld [vmem:[#allocation5 + $0x10] sm:$0xff]  ;;  %v418_v46 = vld [vmem:[#allocation5 + $0x18] sm:$0xff]  ;;  %v507_v47 = vld [vmem:[#allocation8 + $0x60] sm:$0xff] }
  0x4f   : > { %481 = vmatpush.msra.mxu1 %v430_v22  ;;  %571 = vmatpush.msra.mxu2 %v513_v35  ;;  %v541_v48 = vld [vmem:[#allocation8 + $0x170] sm:$0xff]  ;;  %v415_v49 = vld [vmem:[#allocation5] sm:$0xff]  ;;  %v416_v50 = vld [vmem:[#allocation5 + $0x8] sm:$0xff] }
  0x50   : > { %462 = vmatpush.msra.mxu0 %v427_v25  ;;  %591 = vmatpush.msra.mxu3 %v545_v40  ;;  %v414_v51 = vld [vmem:[%s1368_s1] sm:$0xff]  ;;  %v539_v55 = vld [vmem:[#allocation8 + $0x160] sm:$0xff] }
  0x51   : > { %482 = vmatpush.msra.mxu1 %v428_v26  ;;  %572 = vmatpush.msra.mxu2 %v511_v39  ;;  %v505_v54 = vld [vmem:[#allocation8 + $0x50] sm:$0xff]  ;;  %v503_v58 = vld [vmem:[#allocation8 + $0x40] sm:$0xff]  ;;  %v554_v61 = vld [vmem:[#allocation8 + $0x1d8] sm:$0xff] }
  0x52   : > { %463 = vmatpush.msra.mxu0 %v425_v29  ;;  %592 = vmatpush.msra.mxu3 %v543_v44  ;;  %v537_v59 = vld [vmem:[#allocation8 + $0x150] sm:$0xff]  ;;  %v535_v63 = vld [vmem:[#allocation8 + $0x140] sm:$0xff]  ;;  %v520_v0 = vld [vmem:[#allocation8 + $0xc8] sm:$0xff] }
  0x53   : > { %483 = vmatpush.msra.mxu1 %v426_v30  ;;  %573 = vmatpush.msra.mxu2 %v509_v43  ;;  %v501_v62 = vld [vmem:[#allocation8 + $0x30] sm:$0xff]  ;;  %v552_v1 = vld [vmem:[#allocation8 + $0x1c8] sm:$0xff]  ;;  %v518_v2 = vld [vmem:[#allocation8 + $0xb8] sm:$0xff] }
  0x54   : > { %464 = vmatpush.msra.mxu0 %v423_v33  ;;  %593 = vmatpush.msra.mxu3 %v541_v48  ;;  %v550_v3 = vld [vmem:[#allocation8 + $0x1b8] sm:$0xff]  ;;  %v516_v4 = vld [vmem:[#allocation8 + $0xa8] sm:$0xff]  ;;  %v499_v19 = vld [vmem:[#allocation8 + $0x20] sm:$0xff] }
  0x55   : > { %484 = vmatpush.msra.mxu1 %v424_v34  ;;  %574 = vmatpush.msra.mxu2 %v507_v47  ;;  %v548_v5 = vld [vmem:[#allocation8 + $0x1a8] sm:$0xff]  ;;  %v514_v6 = vld [vmem:[#allocation8 + $0x98] sm:$0xff]  ;;  %v533_v20 = vld [vmem:[#allocation8 + $0x130] sm:$0xff] }
  0x56   : > { %465 = vmatpush.msra.mxu0 %v421_v37  ;;  %594 = vmatpush.msra.mxu3 %v539_v55  ;;  %v546_v7 = vld [vmem:[#allocation8 + $0x198] sm:$0xff]  ;;  %v512_v8 = vld [vmem:[#allocation8 + $0x88] sm:$0xff]  ;;  %v497_v23 = vld [vmem:[#allocation8 + $0x10] sm:$0xff] }
  0x57   : > { %485 = vmatpush.msra.mxu1 %v422_v38  ;;  %575 = vmatpush.msra.mxu2 %v505_v54  ;;  %v544_v9 = vld [vmem:[#allocation8 + $0x188] sm:$0xff]  ;;  %v510_v10 = vld [vmem:[#allocation8 + $0x78] sm:$0xff]  ;;  %v531_v24 = vld [vmem:[#allocation8 + $0x120] sm:$0xff] }
  0x58   : > { %466 = vmatpush.msra.mxu0 %v419_v41  ;;  %595 = vmatpush.msra.mxu3 %v537_v59  ;;  %v542_v11 = vld [vmem:[#allocation8 + $0x178] sm:$0xff]  ;;  %v508_v12 = vld [vmem:[#allocation8 + $0x68] sm:$0xff]  ;;  %v495_v27 = vld [vmem:[#allocation8] sm:$0xff] }
  0x59   : > { %486 = vmatpush.msra.mxu1 %v420_v42  ;;  %576 = vmatpush.msra.mxu2 %v503_v58  ;;  %v540_v13 = vld [vmem:[#allocation8 + $0x168] sm:$0xff]  ;;  %v506_v14 = vld [vmem:[#allocation8 + $0x58] sm:$0xff]  ;;  %v529_v28 = vld [vmem:[#allocation8 + $0x110] sm:$0xff] }
  0x5a   : > { %467 = vmatpush.msra.mxu0 %v417_v45  ;;  %596 = vmatpush.msra.mxu3 %v535_v63  ;;  %v538_v15 = vld [vmem:[#allocation8 + $0x158] sm:$0xff]  ;;  %v504_v16 = vld [vmem:[#allocation8 + $0x48] sm:$0xff]  ;;  %v527_v31 = vld [vmem:[#allocation8 + $0x100] sm:$0xff] }
  0x5b   : > { %487 = vmatpush.msra.mxu1 %v418_v46  ;;  %577 = vmatpush.msra.mxu2 %v501_v62  ;;  %v536_v17 = vld [vmem:[#allocation8 + $0x148] sm:$0xff]  ;;  %v502_v18 = vld [vmem:[#allocation8 + $0x38] sm:$0xff]  ;;  %v677_v34 = vld [vmem:[#allocation10 + $0xf0] sm:$0xff] }
  0x5c   : > { %468 = vmatpush.msra.mxu0 %v415_v49  ;;  %v500_v21 = vld [vmem:[#allocation8 + $0x28] sm:$0xff]  ;;  %597 = vmatpush.msra.mxu3 %v533_v20  ;;  %v534_v22 = vld [vmem:[#allocation8 + $0x138] sm:$0xff]  ;;  %v661_v36 = vld [vmem:[#allocation10 + $0x70] sm:$0xff] }
  0x5d   : > { %488 = vmatpush.msra.mxu1 %v416_v50  ;;  %469 = vmatmul.f32.vlgmr.msra.gmra.mxu0 %v414_v51  ;;  %v498_v25 = vld [vmem:[#allocation8 + $0x18] sm:$0xff]  ;;  %v532_v26 = vld [vmem:[#allocation8 + $0x128] sm:$0xff]  ;;  %v675_v39 = vld [vmem:[#allocation10 + $0xe0] sm:$0xff] }
  0x5e   : > { %489 = vmatmul.f32.vlgmr.msra.gmra.mxu1 %v414_v51  ;;  %605 = vmatpush.msrb.mxu0 %v526_v52  ;;  %v496_v29 = vld [vmem:[#allocation8 + $0x8] sm:$0xff]  ;;  %v530_v30 = vld [vmem:[#allocation8 + $0x118] sm:$0xff]  ;;  %v659_v40 = vld [vmem:[#allocation10 + $0x60] sm:$0xff] }
  0x5f   : > { %625 = vmatpush.msrb.mxu1 %v558_v53  ;;  %578 = vmatpush.msra.mxu2 %v499_v19  ;;  %v528_v32 = vld [vmem:[#allocation8 + $0x108] sm:$0xff]  ;;  %v678_v33 = vld [vmem:[#allocation10 + $0xf8] sm:$0xff]  ;;  %v673_v43 = vld [vmem:[#allocation10 + $0xd0] sm:$0xff] }
  0x60   : > { %606 = vmatpush.msrb.mxu0 %v524_v56  ;;  %598 = vmatpush.msra.mxu3 %v531_v24  ;;  %v662_v35 = vld [vmem:[#allocation10 + $0x78] sm:$0xff]  ;;  %v676_v37 = vld [vmem:[#allocation10 + $0xe8] sm:$0xff]  ;;  %v657_v44 = vld [vmem:[#allocation10 + $0x50] sm:$0xff] }
  0x61   : > { %626 = vmatpush.msrb.mxu1 %v556_v57  ;;  %579 = vmatpush.msra.mxu2 %v497_v23  ;;  %v660_v38 = vld [vmem:[#allocation10 + $0x68] sm:$0xff]  ;;  %v674_v41 = vld [vmem:[#allocation10 + $0xd8] sm:$0xff]  ;;  %v671_v47 = vld [vmem:[#allocation10 + $0xc0] sm:$0xff] }
  0x62   : > { %607 = vmatpush.msrb.mxu0 %v522_v60  ;;  %599 = vmatpush.msra.mxu3 %v529_v28  ;;  %v658_v42 = vld [vmem:[#allocation10 + $0x58] sm:$0xff]  ;;  %v672_v45 = vld [vmem:[#allocation10 + $0xc8] sm:$0xff]  ;;  %v655_v48 = vld [vmem:[#allocation10 + $0x40] sm:$0xff] }
  0x63   : > { %627 = vmatpush.msrb.mxu1 %v554_v61  ;;  %580 = vmatpush.msra.mxu2 %v495_v27  ;;  %v656_v46 = vld [vmem:[#allocation10 + $0x48] sm:$0xff]  ;;  %v670_v49 = vld [vmem:[#allocation10 + $0xb8] sm:$0xff]  ;;  %v669_v51 = vld [vmem:[#allocation10 + $0xb0] sm:$0xff] }
  0x64   : > { %608 = vmatpush.msrb.mxu0 %v520_v0  ;;  %600 = vmatpush.msra.mxu3 %v527_v31  ;;  %v654_v50 = vld [vmem:[#allocation10 + $0x38] sm:$0xff]  ;;  %v668_v52 = vld [vmem:[#allocation10 + $0xa8] sm:$0xff]  ;;  %v667_v54 = vld [vmem:[#allocation10 + $0xa0] sm:$0xff] }
  0x65   : > { %628 = vmatpush.msrb.mxu1 %v552_v1  ;;  %683 = vmatpush.msrb.mxu2 %v662_v35  ;;  %v447_v53 = vld [vmem:[#allocation7] sm:$0x3]  ;;  %v653_v63 = vld [vmem:[#allocation10 + $0x30] sm:$0xff]  ;;  %v652_v1 = vld [vmem:[#allocation10 + $0x28] sm:$0xff] }
  0x66   : > { %609 = vmatpush.msrb.mxu0 %v518_v2  ;;  %703 = vmatpush.msrb.mxu3 %v678_v33  ;;  %v449_v55 = vperm.slane %v447_v53, 0  ;;  %v450_v56 = vperm.slane %v447_v53, 1  ;;  %v666_v0 = vld [vmem:[#allocation10 + $0x98] sm:$0xff]  ;;  %v665_v2 = vld [vmem:[#allocation10 + $0x90] sm:$0xff]  ;;  %v959_v23 = vld [vmem:[%s1430_s6] ss:$0 sm:$0xff] }
  0x67   : > { %629 = vmatpush.msrb.mxu1 %v550_v3  ;;  %684 = vmatpush.msrb.mxu2 %v661_v36  ;;  %v651_v3 = vld [vmem:[#allocation10 + $0x20] sm:$0xff] }
  0x68   : > { %610 = vmatpush.msrb.mxu0 %v516_v4  ;;  %704 = vmatpush.msrb.mxu3 %v677_v34  ;;  %v664_v4 = vld [vmem:[#allocation10 + $0x88] sm:$0xff] }
  0x69   : > { %630 = vmatpush.msrb.mxu1 %v548_v5  ;;  %685 = vmatpush.msrb.mxu2 %v660_v38  ;;  %v650_v5 = vld [vmem:[#allocation10 + $0x18] sm:$0xff] }
  0x6a   : > { %611 = vmatpush.msrb.mxu0 %v514_v6  ;;  %705 = vmatpush.msrb.mxu3 %v676_v37  ;;  %v663_v6 = vld [vmem:[#allocation10 + $0x80] sm:$0xff] }
  0x6b   : > { %631 = vmatpush.msrb.mxu1 %v546_v7  ;;  %686 = vmatpush.msrb.mxu2 %v659_v40  ;;  %v649_v7 = vld [vmem:[#allocation10 + $0x10] sm:$0xff] }
  0x6c   : > { %612 = vmatpush.msrb.mxu0 %v512_v8  ;;  %706 = vmatpush.msrb.mxu3 %v675_v39  ;;  %v648_v8 = vld [vmem:[#allocation10 + $0x8] sm:$0xff] }
  0x6d   : > { %632 = vmatpush.msrb.mxu1 %v544_v9  ;;  %687 = vmatpush.msrb.mxu2 %v658_v42  ;;  %v647_v9 = vld [vmem:[#allocation10] sm:$0xff] }
  0x6e   : > { %613 = vmatpush.msrb.mxu0 %v510_v10  ;;  %707 = vmatpush.msrb.mxu3 %v674_v41  ;;  %v559_v10 = vld [vmem:[%s1428_s4] sm:$0x3] }
  0x6f   : > { %633 = vmatpush.msrb.mxu1 %v542_v11  ;;  %688 = vmatpush.msrb.mxu2 %v657_v44  ;;  %v562_v11 = vperm.slane %v559_v10, 1 }
  0x70   : > { %614 = vmatpush.msrb.mxu0 %v508_v12  ;;  %708 = vmatpush.msrb.mxu3 %v673_v43 }
  0x71   : > { %634 = vmatpush.msrb.mxu1 %v540_v13  ;;  %689 = vmatpush.msrb.mxu2 %v656_v46 }
  0x72   : > { %615 = vmatpush.msrb.mxu0 %v506_v14  ;;  %709 = vmatpush.msrb.mxu3 %v672_v45 }
  0x73   : > { %635 = vmatpush.msrb.mxu1 %v538_v15  ;;  %690 = vmatpush.msrb.mxu2 %v655_v48 }
  0x74   : > { %616 = vmatpush.msrb.mxu0 %v504_v16  ;;  %710 = vmatpush.msrb.mxu3 %v671_v47  ;;  %v561_v16 = vperm.slane %v559_v10, 0 }
  0x75   : > { %636 = vmatpush.msrb.mxu1 %v536_v17  ;;  %691 = vmatpush.msrb.mxu2 %v654_v50 }
  0x76   : > { %617 = vmatpush.msrb.mxu0 %v502_v18  ;;  %711 = vmatpush.msrb.mxu3 %v670_v49 }
  0x77   : > { %637 = vmatpush.msrb.mxu1 %v534_v22  ;;  %692 = vmatpush.msrb.mxu2 %v653_v63 }
  0x78   : > { %618 = vmatpush.msrb.mxu0 %v500_v21  ;;  %712 = vmatpush.msrb.mxu3 %v669_v51 }
  0x79   : > { %638 = vmatpush.msrb.mxu1 %v532_v26  ;;  %693 = vmatpush.msrb.mxu2 %v652_v1 }
  0x7a   : > { %619 = vmatpush.msrb.mxu0 %v498_v25  ;;  %713 = vmatpush.msrb.mxu3 %v668_v52 }
  0x7b   : > { %639 = vmatpush.msrb.mxu1 %v530_v30  ;;  %694 = vmatpush.msrb.mxu2 %v651_v3 }
  0x7c   : > { %620 = vmatpush.msrb.mxu0 %v496_v29  ;;  %714 = vmatpush.msrb.mxu3 %v667_v54 }
  0x7d   : > { %640 = vmatpush.msrb.mxu1 %v528_v32  ;;  %695 = vmatpush.msrb.mxu2 %v650_v5 }
  0x7e   : > { %715 = vmatpush.msrb.mxu3 %v666_v0 }
  0x7f   : > { %696 = vmatpush.msrb.mxu2 %v649_v7 }
  0x80   : > { %716 = vmatpush.msrb.mxu3 %v665_v2 }
  0x81   : > { %697 = vmatpush.msrb.mxu2 %v648_v8 }
  0x82   : > { %717 = vmatpush.msrb.mxu3 %v664_v4 }
  0x83   : > { %698 = vmatpush.msrb.mxu2 %v647_v9 }
  0x84   : > { %718 = vmatpush.msrb.mxu3 %v663_v6 }
  0xda   : > { %v470_v57 = vpop.f32.mrf.mxu0 }
  0xdb   : > { %v490_v58 = vpop.f32.mrf.mxu1  ;;  %v471_v59 = vadd.f32 %v470_v57, %v449_v55 }
  0xdc   : > { %v491_v60 = vadd.f32 %v490_v58, %v450_v56 }
  0xdd   : > { %v493_v61 = vmax.f32 %v471_v59, 0.0 }
  0xde   : > { %v494_v62 = vmax.f32 %v491_v60, 0.0 }
  0xdf   : > { %581 = vmatmul.f32.vlgmr.msra.gmra.mxu2 %v493_v61  ;;  %621 = vmatmul.f32.vlgmr.msrb.gmra.mxu0 %v493_v61 }
  0xe0   : > { %601 = vmatmul.f32.vlgmr.msra.gmra.mxu3 %v494_v62  ;;  %641 = vmatmul.f32.vlgmr.msrb.gmra.mxu1 %v494_v62 }
 0x15c   : > { %v622_v12 = vpop.f32.mrf.mxu0 }
 0x15d   : > { %v623_v13 = vadd.f32 %v622_v12, %v562_v11  ;;  %v642_v14 = vpop.f32.mrf.mxu1 }
 0x15f   : > { %v643_v15 = vadd.f32 %v642_v14, %v623_v13 }
 0x161   : > { %v646_v17 = vmax.f32 %v643_v15, 0.0 }
 0x162   : > { %v582_v18 = vpop.f32.mrf.mxu2 }
 0x163   : > { %v583_v19 = vadd.f32 %v582_v18, %v561_v16  ;;  %719 = vmatmul.f32.vlgmr.msrb.gmra.mxu3 %v646_v17  ;;  %v602_v20 = vpop.f32.mrf.mxu3 }
 0x165   : > { %v603_v21 = vadd.f32 %v602_v20, %v583_v19 }
 0x167   : > { %v645_v22 = vmax.f32 %v603_v21, 0.0 }
 0x169   : > { %699 = vmatmul.f32.vlgmr.msrb.gmra.mxu2 %v645_v22 }
 0x1e6   : > { %v720_v26 = vpop.f32.mrf.mxu3 }
 0x1ec   : > { %v700_v24 = vpop.f32.mrf.mxu2 }
 0x1ed   : > { %v701_v25 = vadd.f32 %v959_v23, %v700_v24 }
 0x1ef   : > { %v721_v27 = vadd.f32 %v720_v26, %v701_v25 }
 0x1f1   : > { %723 = vst [vmem:[%s413_s16] sm:$0xff] %v721_v27 }
 0x1f2   : > { %1137 = shalt.err (!%p1134_p9)
}
 0x1f3   : > { %886 = dma.vmem_to_hbm [thread:$0]  (%p1331_p4), %s738_s18, 128, %s740_s13, %s725_s14  }
 0x1f4 PF: > { %s751_s28 = sand.u32 1, %s1172_s30   ;;  %p1445_p10 = scmp.ge.s32.totalorder %s1184_s12, 2 }
 0x1f5   : > { %s752_s20 = scalar_lea.sflag [#allocation4], %s751_s28 }
 0x1f6   : > { %p906_p13 = pnand %p1445_p10, %p1335_p6 }
 0x1f8   : > { %p907_p11 = pneg %p906_p13 }
 0x1fa   : > { %1167 = dma.done.wait (%p907_p11), %s752_s20, 128  }
 0x1fb   : > { %1169 = vsyncadd (%p907_p11), %s752_s20, 4294967168  ;;  %p24_p0 = scmp.ge.s32.totalorder %s1305_s23, 4   ;;  %s1446_s30 = smov %s1176_s10 }
 0x1fc   : > { %s1447_s10 = smov %s1180_s11  ;;  %s1448_s11 = smov %s1316_s24 }
 0x1fd   : > { %s1449_s12 = smov %s1305_s23  ;;  %26 = sbr.rel (!%p24_p0) target bundleno = 10 (0xa), region = 117 }
 0x202   :  { %758 = vsyncpa [#allocation3], 1 }
 0x203   :  { %760 = vsyncpa [#allocation3 + $0x1], 1 }
 0x204   :  { %761 = vsyncpa [#allocation6], 1 }
 0x205   :  { %762 = vsyncpa [#allocation9], 1 }
 0x206   :  { %763 = vsyncpa [#allocation4], 1 }
 0x207   :  { %765 = vsyncpa [#allocation4 + $0x1], 1 }

</bundles_post_ra>
